<compile_context>
chip_gen: v6e
topology: v6e:2x2x1
jax: 0.10.0
libtpu: 0.0.40
codegen_flags: <defaults>
</compile_context>

<pallas_src>
import functools

import jax
import jax.numpy as jnp
from jax.experimental import pallas as pl
from jax.experimental.pallas import tpu as pltpu

_LANE = 128
_SUBLANE = 8
_TARGET_BLOCK_BYTES = 4 * 1024 * 1024  # ~4 MiB per buffer (x4 when double-buffered)


def _identity_kernel(x_ref, o_ref):
    # Pure pass-through of the current VMEM tile.
    o_ref[...] = x_ref[...]


@functools.partial(jax.jit)
def identity(x: jax.Array) -> jax.Array:
    """Identity forward pass implemented as a Pallas TPU copy kernel."""
    if x.size == 0:
        return x  # nothing to move

    orig_shape = x.shape
    dtype = x.dtype
    itemsize = jnp.dtype(dtype).itemsize
    total = x.size

    # Packing-aware sublane multiple (8 for f32, 16 for bf16, 32 for int8).
    sublane = _SUBLANE * max(1, 4 // itemsize)

    # Lane-dense column width: wide (4096 lanes) for big arrays, 128 otherwise.
    cols = 4096 if total >= 4096 * sublane else _LANE

    rows = pl.cdiv(total, cols)
    rows_aligned = pl.cdiv(rows, sublane) * sublane

    # Rows per block: as many sublane-groups as fit in the byte budget.
    rows_per_block = max(
        sublane,
        (_TARGET_BLOCK_BYTES // (cols * itemsize) // sublane) * sublane,
    )
    tile_rows = min(rows_aligned, rows_per_block)

    padded_rows = pl.cdiv(rows_aligned, tile_rows) * tile_rows
    padded_total = padded_rows * cols

    flat = x.reshape(-1)
    if padded_total != total:
        flat = jnp.pad(flat, (0, padded_total - total))
    x2d = flat.reshape(padded_rows, cols)

    grid = (padded_rows // tile_rows,)

    out2d = pl.pallas_call(
        _identity_kernel,
        out_shape=jax.ShapeDtypeStruct((padded_rows, cols), dtype),
        grid_spec=pltpu.PrefetchScalarGridSpec(
            num_scalar_prefetch=0,
            grid=grid,
            in_specs=[pl.BlockSpec((tile_rows, cols), lambda i: (i, 0))],
            out_specs=pl.BlockSpec((tile_rows, cols), lambda i: (i, 0)),
        ),
        # Output aliases the input buffer: no separate output allocation, and
        # with a donatable input no extra HBM stream is created.
        input_output_aliases={0: 0},
        compiler_params=pltpu.CompilerParams(
            # 1-D grid sharded across both TensorCores on v7x; neutral on
            # single-TC v5e/v6e.
            dimension_semantics=("parallel",),
            # Above v5e(16 MiB)/v6e(32 MiB) scoped defaults, below v7x's
            # 64 MiB physical VMEM.
            vmem_limit_bytes=48 * 1024 * 1024,
        ),
        cost_estimate=pl.CostEstimate(
            flops=0,
            transcendentals=0,
            bytes_accessed=2 * total * itemsize,
        ),
    )(x2d)

    out = out2d.reshape(-1)
    if padded_total != total:
        out = out[:total]
    return out.reshape(orig_shape)


if __name__ == "__main__":
    key = jax.random.PRNGKey(0)
    # NCHW input, matching PyTorch conv conventions.
    x = jax.random.normal(key, (2, 4, 16, 16), dtype=jnp.float32)

    y = identity(x)
    jax.block_until_ready(y)

    assert y.shape == x.shape
    assert y.dtype == x.dtype
    assert jnp.array_equal(y, x)

    print("KERNEL_OK")
</pallas_src>

<mosaic_0001>
module attributes {stable_mosaic.version = 11 : i64} {
  func.func @_identity_kernel(%arg0: i32, %arg1: memref<16x128xf32, #tpu.memory_space<vmem>>, %arg2: memref<16x128xf32, #tpu.memory_space<vmem>>) attributes {dimension_semantics = [#tpu.dimension_semantics<parallel>], iteration_bounds = array<i64: 1>, scalar_prefetch = 0 : i64, scratch_operands = 0 : i64, tpu.core_type = #tpu.core_type<tc>, window_params = [{transform_indices = @transform_0, window_bounds = array<i64: 16, 128>}, {transform_indices = @transform_1, window_bounds = array<i64: 16, 128>}]} {
    %c0 = arith.constant 0 : index
    %c0_0 = arith.constant 0 : index
    %0 = vector.load %arg1[%c0, %c0_0] : memref<16x128xf32, #tpu.memory_space<vmem>>, vector<16x128xf32>
    %c0_1 = arith.constant 0 : index
    %c0_2 = arith.constant 0 : index
    %1 = vector.load %arg2[%c0_1, %c0_2] : memref<16x128xf32, #tpu.memory_space<vmem>>, vector<16x128xf32>
    tpu.vector_store %arg2[%c0_1, %c0_2], %0 {strides = array<i32>} : memref<16x128xf32, #tpu.memory_space<vmem>>, vector<16x128xf32>,
    return
  }
  func.func @transform_0(%arg0: i32) -> (i32, i32) {
    %c0_i32 = arith.constant 0 : i32
    %c0_i32_0 = arith.constant 0 : i32
    return %arg0, %c0_i32 : i32, i32
  }
  func.func @transform_1(%arg0: i32) -> (i32, i32) {
    %c0_i32 = arith.constant 0 : i32
    %c0_i32_0 = arith.constant 0 : i32
    return %arg0, %c0_i32 : i32, i32
  }
}

</mosaic_0001>

<bundles_post_ra>
// kernel: identity.1
= control target key start
LH: loop header
LB: loop body
LE: loop exit
PB: predicated region body
PF: predicated region fallthrough
CT: control target
= control target key end

     0   :  { %s38_s0 = inlined_call_operand.vmem [shape: f32[16,128], index: 0, kind: input, shape index: {}, may-alias: {0,1}]   ;;  %s39_s1 = inlined_call_operand.vmem [shape: f32[16,128], index: 1, kind: output, shape index: {}, may-alias: {0,1}]  }
   0x1   :  { %v8_v0 = vld [vmem:[%s38_s0] sm:$0xff]  ;;  %v9_v1 = vld [vmem:[%s38_s0 + $0x8] sm:$0xff] }
   0x2   :  { %10 = vst [vmem:[%s39_s1] sm:$0xff] %v8_v0  ;;  %11 = vst [vmem:[%s39_s1 + $0x8] sm:$0xff] %v9_v1 }

</bundles_post_ra>
